<compile_context>
chip_gen: v5e
topology: v5e:2x2
jax: 0.10.0
libtpu: 0.0.40
codegen_flags: <defaults>
</compile_context>

<pallas_src>
import functools

import jax
import jax.numpy as jnp
from jax.experimental import pallas as pl
from jax.experimental.pallas import tpu as pltpu


def _cross_attn_kernel(x1_ref, x2_ref, wqkv_ref, wproj_ref, bproj_ref,
                       out_ref, *, batch, num_heads, head_dim, scale):
    B, H, D = batch, num_heads, head_dim
    C = H * D
    M = x1_ref.shape[0]          # B * N
    N = M // B
    M2 = 2 * M

    # One tall (2M, C) bf16 activation slab: rows [0, M) = x1, [M, 2M) = x2.
    # Cast f32 -> bf16 in VMEM (no extra HBM round trip in the wrapper).
    x_cat = jnp.concatenate([x1_ref[...], x2_ref[...]],
                            axis=0).astype(jnp.bfloat16)            # (2M, C)

    # y = x @ w.T : contract on the weight's "in" axis (no transpose op).
    dn_wt = (((1,), (1,)), ((), ()))

    # Single fused qkv projection for BOTH inputs: (2M, C) x (3C, C)^T.
    qkv = jax.lax.dot_general(x_cat, wqkv_ref[...], dn_wt,
                              preferred_element_type=jnp.float32)   # (2M, 3C) f32

    q_all = qkv[:, 0 * C:1 * C] * scale    # scale folded into q (O(2M*C))
    k_all = qkv[:, 1 * C:2 * C]
    v_all = qkv[:, 2 * C:3 * C]

    # Cross attention swaps the query source (branch "x1": q<-x2, k/v<-x1 and
    # vice versa).  Swap the two M-row halves of q once so both branches pair
    # with natural-order k/v in the same batched matmuls.
    q_sw = jnp.concatenate([q_all[M:, :], q_all[:M, :]], axis=0)    # (2M, C)

    # Per-head attention from static lane slices (no (0,2,1,3) relayouts).
    head_outs = []
    for h in range(H):
        sl = slice(h * D, (h + 1) * D)
        qh = q_sw[:, sl].reshape(2 * B, N, D).astype(jnp.bfloat16)
        kh = k_all[:, sl].reshape(2 * B, N, D).astype(jnp.bfloat16)
        vh = v_all[:, sl].reshape(2 * B, N, D).astype(jnp.bfloat16)

        # scores over the merged (2*B) batch axis -> (2B, N, N) in f32.
        s = jax.lax.dot_general(qh, kh, (((2,), (2,)), ((0,), (0,))),
                                preferred_element_type=jnp.float32)
        s = s - jnp.max(s, axis=-1, keepdims=True)
        p = jnp.exp(s)
        p = p * pl.reciprocal(jnp.sum(p, axis=-1, keepdims=True), approx=True)

        # attention @ v -> (2B, N, D) f32.
        oh = jax.lax.dot_general(p.astype(jnp.bfloat16), vh,
                                 (((2,), (1,)), ((0,), (0,))),
                                 preferred_element_type=jnp.float32)
        head_outs.append(oh.reshape(M2, D))

    # Lane-concat of head outputs == the (B, N, H*D) layout the proj expects.
    y = jnp.concatenate(head_outs, axis=-1).astype(jnp.bfloat16)    # (2M, C)

    # Single tall output projection for both branches (+ f32 bias).
    out = jax.lax.dot_general(y, wproj_ref[...], dn_wt,
                              preferred_element_type=jnp.float32) + bproj_ref[...]
    out_ref[...] = out.reshape(2, M, C).astype(out_ref.dtype)


def cross_attention(x1, x2, w_qkv, w_proj, b_proj, *, num_heads):
    """Pallas implementation of CrossAttention.forward.

    x1, x2  : (B, N, C) float32
    w_qkv   : (3C, C)  -- PyTorch Linear weight (out, in), qkv_bias=False
    w_proj  : (C, C)   -- PyTorch Linear weight (out, in)
    b_proj  : (C,)
    Returns (x2_out, x1_out) in bf16, mirroring the PyTorch (x2, x1) order.
    """
    B, N, C = x1.shape
    H = num_heads
    D = C // H
    M = B * N
    scale = D ** (-0.5)

    # Leading-dim reshapes of contiguous arrays are free (no copy).
    x1f = jnp.reshape(x1, (M, C))
    x2f = jnp.reshape(x2, (M, C))

    # Weights assumed bf16-resident in deployment; cast once here.
    wqkv = jnp.asarray(w_qkv, jnp.bfloat16)                  # (3C, C)
    wproj = jnp.asarray(w_proj, jnp.bfloat16)                # (C, C)
    bproj = jnp.asarray(b_proj, jnp.float32).reshape(1, C)   # (1, C)

    kernel = functools.partial(_cross_attn_kernel, batch=B, num_heads=H,
                               head_dim=D, scale=scale)

    # Advisory cost for XLA scheduling around the custom call.
    flops = int(2 * (2 * M) * C * (3 * C)          # fused qkv projection
                + 2 * (2 * M) * C * C              # output projection
                + 8 * B * H * N * N * D)           # scores + p@v, both branches
    transcendentals = int(2 * B * H * N * (N + 1))  # exp + approx recip
    bytes_accessed = int(2 * M * C * 4              # x1 + x2 (f32)
                         + (3 * C * C + C * C) * 2  # weights (bf16)
                         + C * 4                    # bias (f32)
                         + 2 * M * C * 2)           # output (bf16)

    out = pl.pallas_call(
        kernel,
        out_shape=jax.ShapeDtypeStruct((2, M, C), jnp.bfloat16),
        grid_spec=pltpu.PrefetchScalarGridSpec(
            num_scalar_prefetch=0,
            grid=(1,),
            in_specs=[
                pl.BlockSpec((M, C), lambda i: (0, 0)),          # x1 tokens
                pl.BlockSpec((M, C), lambda i: (0, 0)),          # x2 tokens
                pl.BlockSpec((3 * C, C), lambda i: (0, 0)),      # qkv weight
                pl.BlockSpec((C, C), lambda i: (0, 0)),          # proj weight
                pl.BlockSpec((1, C), lambda i: (0, 0)),          # proj bias
            ],
            out_specs=pl.BlockSpec((2, M, C), lambda i: (0, 0, 0)),
        ),
        compiler_params=pltpu.CompilerParams(
            dimension_semantics=("arbitrary",)),
        cost_estimate=pl.CostEstimate(flops=flops,
                                      transcendentals=transcendentals,
                                      bytes_accessed=bytes_accessed),
    )(x1f, x2f, wqkv, wproj, bproj)

    x1_out = out[0].reshape(B, N, C)
    x2_out = out[1].reshape(B, N, C)
    # PyTorch module returns (x2, x1)
    return x2_out, x1_out


def _reference(x1, x2, w_qkv, w_proj, b_proj, num_heads):
    """Pure-JAX f32 reference mirroring the PyTorch forward."""
    B, N, C = x1.shape
    D = C // num_heads
    scale = D ** (-0.5)

    def qkv_split(x):
        qkv = x @ w_qkv.T                                    # (B, N, 3C)
        qkv = qkv.reshape(B, N, 3, num_heads, D)
        qkv = jnp.transpose(qkv, (2, 0, 3, 1, 4))            # (3, B, H, N, D)
        return qkv[0], qkv[1], qkv[2]

    q1, k1, v1 = qkv_split(x1)
    q2, k2, v2 = qkv_split(x2)

    def attend(q, k, v):
        a = (q @ jnp.swapaxes(k, -2, -1)) * scale
        a = jax.nn.softmax(a, axis=-1)
        o = a @ v                                            # (B, H, N, D)
        return jnp.transpose(o, (0, 2, 1, 3)).reshape(B, N, C)

    y1 = attend(q2, k1, v1)
    y2 = attend(q1, k2, v2)
    y1 = y1 @ w_proj.T + b_proj
    y2 = y2 @ w_proj.T + b_proj
    return y2, y1


if __name__ == "__main__":
    B, N, C = 2, 8, 32
    num_heads = 4  # head_dim = 8

    key = jax.random.PRNGKey(0)
    k1, k2, k3, k4, k5 = jax.random.split(key, 5)
    x1 = jax.random.normal(k1, (B, N, C), jnp.float32)
    x2 = jax.random.normal(k2, (B, N, C), jnp.float32)
    w_qkv = 0.05 * jax.random.normal(k3, (3 * C, C), jnp.float32)   # qkv_bias=False
    w_proj = 0.05 * jax.random.normal(k4, (C, C), jnp.float32)
    b_proj = 0.01 * jax.random.normal(k5, (C,), jnp.float32)

    out2, out1 = cross_attention(x1, x2, w_qkv, w_proj, b_proj,
                                 num_heads=num_heads)
    jax.block_until_ready((out2, out1))

    ref2, ref1 = _reference(x1, x2, w_qkv, w_proj, b_proj, num_heads)
    # bf16 MXU operands / bf16 output with f32 accumulation: ~1e-2 agreement.
    assert jnp.allclose(out2.astype(jnp.float32), ref2, atol=2e-2, rtol=2e-2)
    assert jnp.allclose(out1.astype(jnp.float32), ref1, atol=2e-2, rtol=2e-2)

    print("KERNEL_OK")
</pallas_src>

<mosaic_0001>
module attributes {stable_mosaic.version = 11 : i64} {
  func.func @_cross_attn_kernel(%arg0: i32, %arg1: memref<16x32xf32, #tpu.memory_space<vmem>>, %arg2: memref<16x32xf32, #tpu.memory_space<vmem>>, %arg3: memref<96x32xbf16, #tpu.memory_space<vmem>>, %arg4: memref<32x32xbf16, #tpu.memory_space<vmem>>, %arg5: memref<1x32xf32, #tpu.memory_space<vmem>>, %arg6: memref<2x16x32xbf16, #tpu.memory_space<vmem>>) attributes {dimension_semantics = [#tpu.dimension_semantics<arbitrary>], iteration_bounds = array<i64: 1>, scalar_prefetch = 0 : i64, scratch_operands = 0 : i64, tpu.core_type = #tpu.core_type<tc>, window_params = [{pipeline_mode = #tpu.pipeline_mode<synchronous>, transform_indices = @transform_0, window_bounds = array<i64: 16, 32>}, {pipeline_mode = #tpu.pipeline_mode<synchronous>, transform_indices = @transform_1, window_bounds = array<i64: 16, 32>}, {pipeline_mode = #tpu.pipeline_mode<synchronous>, transform_indices = @transform_2, window_bounds = array<i64: 96, 32>}, {pipeline_mode = #tpu.pipeline_mode<synchronous>, transform_indices = @transform_3, window_bounds = array<i64: 32, 32>}, {pipeline_mode = #tpu.pipeline_mode<synchronous>, transform_indices = @transform_4, window_bounds = array<i64: 1, 32>}, {pipeline_mode = #tpu.pipeline_mode<synchronous>, transform_indices = @transform_5, window_bounds = array<i64: 2, 16, 32>}]} {
    %c0 = arith.constant 0 : index
    %c0_0 = arith.constant 0 : index
    %0 = vector.load %arg1[%c0, %c0_0] : memref<16x32xf32, #tpu.memory_space<vmem>>, vector<16x32xf32>
    %c0_1 = arith.constant 0 : index
    %c0_2 = arith.constant 0 : index
    %1 = vector.load %arg2[%c0_1, %c0_2] : memref<16x32xf32, #tpu.memory_space<vmem>>, vector<16x32xf32>
    %2 = tpu.concatenate %0, %1 in 0 : vector<16x32xf32>, vector<16x32xf32> -> vector<32x32xf32>
    %3 = arith.truncf %2 : vector<32x32xf32> to vector<32x32xbf16>
    %c0_3 = arith.constant 0 : index
    %c0_4 = arith.constant 0 : index
    %4 = vector.load %arg3[%c0_3, %c0_4] : memref<96x32xbf16, #tpu.memory_space<vmem>>, vector<96x32xbf16>
    %cst = arith.constant dense<0.000000e+00> : vector<32x96xf32>
    %5 = tpu.matmul %3, %4, %cst {dimension_numbers = #tpu.dot_dimension_numbers<[1], [1], [0], [0], [0, 0, 1, 0], [], []>} : vector<32x32xbf16>, vector<96x32xbf16>, vector<32x96xf32> -> vector<32x96xf32>
    %6 = vector.extract_strided_slice %5 {offsets = [0, 0], sizes = [32, 32], strides = [1, 1]} : vector<32x96xf32> to vector<32x32xf32>
    %cst_5 = arith.constant 0.353553385 : f32
    %7 = vector.broadcast %cst_5 : f32 to vector<32x32xf32>
    %8 = arith.mulf %6, %7 : vector<32x32xf32>
    %9 = vector.extract_strided_slice %5 {offsets = [0, 32], sizes = [32, 32], strides = [1, 1]} : vector<32x96xf32> to vector<32x32xf32>
    %10 = vector.extract_strided_slice %5 {offsets = [0, 64], sizes = [32, 32], strides = [1, 1]} : vector<32x96xf32> to vector<32x32xf32>
    %11 = vector.extract_strided_slice %8 {offsets = [16, 0], sizes = [16, 32], strides = [1, 1]} : vector<32x32xf32> to vector<16x32xf32>
    %12 = vector.extract_strided_slice %8 {offsets = [0, 0], sizes = [16, 32], strides = [1, 1]} : vector<32x32xf32> to vector<16x32xf32>
    %13 = tpu.concatenate %11, %12 in 0 : vector<16x32xf32>, vector<16x32xf32> -> vector<32x32xf32>
    %14 = vector.extract_strided_slice %13 {offsets = [0, 0], sizes = [32, 8], strides = [1, 1]} : vector<32x32xf32> to vector<32x8xf32>
    %15 = vector.shape_cast %14 : vector<32x8xf32> to vector<4x8x8xf32>
    %16 = arith.truncf %15 : vector<4x8x8xf32> to vector<4x8x8xbf16>
    %17 = vector.extract_strided_slice %9 {offsets = [0, 0], sizes = [32, 8], strides = [1, 1]} : vector<32x32xf32> to vector<32x8xf32>
    %18 = vector.shape_cast %17 : vector<32x8xf32> to vector<4x8x8xf32>
    %19 = arith.truncf %18 : vector<4x8x8xf32> to vector<4x8x8xbf16>
    %20 = vector.extract_strided_slice %10 {offsets = [0, 0], sizes = [32, 8], strides = [1, 1]} : vector<32x32xf32> to vector<32x8xf32>
    %21 = vector.shape_cast %20 : vector<32x8xf32> to vector<4x8x8xf32>
    %22 = arith.truncf %21 : vector<4x8x8xf32> to vector<4x8x8xbf16>
    %cst_6 = arith.constant dense<0.000000e+00> : vector<4x8x8xf32>
    %23 = tpu.matmul %16, %19, %cst_6 {dimension_numbers = #tpu.dot_dimension_numbers<[2], [2], [1], [1], [0, 0, 0, 1, 1, 1], [0], [0]>} : vector<4x8x8xbf16>, vector<4x8x8xbf16>, vector<4x8x8xf32> -> vector<4x8x8xf32>
    %cst_7 = arith.constant dense<0xFF800000> : vector<4x8xf32>
    %24 = vector.multi_reduction <maximumf>, %23, %cst_7 [2] : vector<4x8x8xf32> to vector<4x8xf32>
    %25 = vector.shape_cast %24 : vector<4x8xf32> to vector<4x8x1xf32>
    %26 = vector.broadcast %25 : vector<4x8x1xf32> to vector<4x8x8xf32>
    %27 = arith.subf %23, %26 : vector<4x8x8xf32>
    %28 = math.exp %27 : vector<4x8x8xf32>
    %cst_8 = arith.constant dense<0.000000e+00> : vector<4x8xf32>
    %29 = vector.multi_reduction <add>, %28, %cst_8 [2] : vector<4x8x8xf32> to vector<4x8xf32>
    %30 = vector.shape_cast %29 : vector<4x8xf32> to vector<4x8x1xf32>
    %31 = tpu.reciprocal %30 {approx = true} : vector<4x8x1xf32> -> vector<4x8x1xf32>
    %32 = vector.broadcast %31 : vector<4x8x1xf32> to vector<4x8x8xf32>
    %33 = arith.mulf %28, %32 : vector<4x8x8xf32>
    %34 = arith.truncf %33 : vector<4x8x8xf32> to vector<4x8x8xbf16>
    %cst_9 = arith.constant dense<0.000000e+00> : vector<4x8x8xf32>
    %35 = tpu.matmul %34, %22, %cst_9 {dimension_numbers = #tpu.dot_dimension_numbers<[2], [1], [1], [2], [0, 0, 0, 1, 1, 2], [0], [0]>} : vector<4x8x8xbf16>, vector<4x8x8xbf16>, vector<4x8x8xf32> -> vector<4x8x8xf32>
    %36 = vector.shape_cast %35 : vector<4x8x8xf32> to vector<32x8xf32>
    %37 = vector.extract_strided_slice %13 {offsets = [0, 8], sizes = [32, 8], strides = [1, 1]} : vector<32x32xf32> to vector<32x8xf32>
    %38 = vector.shape_cast %37 : vector<32x8xf32> to vector<4x8x8xf32>
    %39 = arith.truncf %38 : vector<4x8x8xf32> to vector<4x8x8xbf16>
    %40 = vector.extract_strided_slice %9 {offsets = [0, 8], sizes = [32, 8], strides = [1, 1]} : vector<32x32xf32> to vector<32x8xf32>
    %41 = vector.shape_cast %40 : vector<32x8xf32> to vector<4x8x8xf32>
    %42 = arith.truncf %41 : vector<4x8x8xf32> to vector<4x8x8xbf16>
    %43 = vector.extract_strided_slice %10 {offsets = [0, 8], sizes = [32, 8], strides = [1, 1]} : vector<32x32xf32> to vector<32x8xf32>
    %44 = vector.shape_cast %43 : vector<32x8xf32> to vector<4x8x8xf32>
    %45 = arith.truncf %44 : vector<4x8x8xf32> to vector<4x8x8xbf16>
    %cst_10 = arith.constant dense<0.000000e+00> : vector<4x8x8xf32>
    %46 = tpu.matmul %39, %42, %cst_10 {dimension_numbers = #tpu.dot_dimension_numbers<[2], [2], [1], [1], [0, 0, 0, 1, 1, 1], [0], [0]>} : vector<4x8x8xbf16>, vector<4x8x8xbf16>, vector<4x8x8xf32> -> vector<4x8x8xf32>
    %cst_11 = arith.constant dense<0xFF800000> : vector<4x8xf32>
    %47 = vector.multi_reduction <maximumf>, %46, %cst_11 [2] : vector<4x8x8xf32> to vector<4x8xf32>
    %48 = vector.shape_cast %47 : vector<4x8xf32> to vector<4x8x1xf32>
    %49 = vector.broadcast %48 : vector<4x8x1xf32> to vector<4x8x8xf32>
    %50 = arith.subf %46, %49 : vector<4x8x8xf32>
    %51 = math.exp %50 : vector<4x8x8xf32>
    %cst_12 = arith.constant dense<0.000000e+00> : vector<4x8xf32>
    %52 = vector.multi_reduction <add>, %51, %cst_12 [2] : vector<4x8x8xf32> to vector<4x8xf32>
    %53 = vector.shape_cast %52 : vector<4x8xf32> to vector<4x8x1xf32>
    %54 = tpu.reciprocal %53 {approx = true} : vector<4x8x1xf32> -> vector<4x8x1xf32>
    %55 = vector.broadcast %54 : vector<4x8x1xf32> to vector<4x8x8xf32>
    %56 = arith.mulf %51, %55 : vector<4x8x8xf32>
    %57 = arith.truncf %56 : vector<4x8x8xf32> to vector<4x8x8xbf16>
    %cst_13 = arith.constant dense<0.000000e+00> : vector<4x8x8xf32>
    %58 = tpu.matmul %57, %45, %cst_13 {dimension_numbers = #tpu.dot_dimension_numbers<[2], [1], [1], [2], [0, 0, 0, 1, 1, 2], [0], [0]>} : vector<4x8x8xbf16>, vector<4x8x8xbf16>, vector<4x8x8xf32> -> vector<4x8x8xf32>
    %59 = vector.shape_cast %58 : vector<4x8x8xf32> to vector<32x8xf32>
    %60 = vector.extract_strided_slice %13 {offsets = [0, 16], sizes = [32, 8], strides = [1, 1]} : vector<32x32xf32> to vector<32x8xf32>
    %61 = vector.shape_cast %60 : vector<32x8xf32> to vector<4x8x8xf32>
    %62 = arith.truncf %61 : vector<4x8x8xf32> to vector<4x8x8xbf16>
    %63 = vector.extract_strided_slice %9 {offsets = [0, 16], sizes = [32, 8], strides = [1, 1]} : vector<32x32xf32> to vector<32x8xf32>
    %64 = vector.shape_cast %63 : vector<32x8xf32> to vector<4x8x8xf32>
    %65 = arith.truncf %64 : vector<4x8x8xf32> to vector<4x8x8xbf16>
    %66 = vector.extract_strided_slice %10 {offsets = [0, 16], sizes = [32, 8], strides = [1, 1]} : vector<32x32xf32> to vector<32x8xf32>
    %67 = vector.shape_cast %66 : vector<32x8xf32> to vector<4x8x8xf32>
    %68 = arith.truncf %67 : vector<4x8x8xf32> to vector<4x8x8xbf16>
    %cst_14 = arith.constant dense<0.000000e+00> : vector<4x8x8xf32>
    %69 = tpu.matmul %62, %65, %cst_14 {dimension_numbers = #tpu.dot_dimension_numbers<[2], [2], [1], [1], [0, 0, 0, 1, 1, 1], [0], [0]>} : vector<4x8x8xbf16>, vector<4x8x8xbf16>, vector<4x8x8xf32> -> vector<4x8x8xf32>
    %cst_15 = arith.constant dense<0xFF800000> : vector<4x8xf32>
    %70 = vector.multi_reduction <maximumf>, %69, %cst_15 [2] : vector<4x8x8xf32> to vector<4x8xf32>
    %71 = vector.shape_cast %70 : vector<4x8xf32> to vector<4x8x1xf32>
    %72 = vector.broadcast %71 : vector<4x8x1xf32> to vector<4x8x8xf32>
    %73 = arith.subf %69, %72 : vector<4x8x8xf32>
    %74 = math.exp %73 : vector<4x8x8xf32>
    %cst_16 = arith.constant dense<0.000000e+00> : vector<4x8xf32>
    %75 = vector.multi_reduction <add>, %74, %cst_16 [2] : vector<4x8x8xf32> to vector<4x8xf32>
    %76 = vector.shape_cast %75 : vector<4x8xf32> to vector<4x8x1xf32>
    %77 = tpu.reciprocal %76 {approx = true} : vector<4x8x1xf32> -> vector<4x8x1xf32>
    %78 = vector.broadcast %77 : vector<4x8x1xf32> to vector<4x8x8xf32>
    %79 = arith.mulf %74, %78 : vector<4x8x8xf32>
    %80 = arith.truncf %79 : vector<4x8x8xf32> to vector<4x8x8xbf16>
    %cst_17 = arith.constant dense<0.000000e+00> : vector<4x8x8xf32>
    %81 = tpu.matmul %80, %68, %cst_17 {dimension_numbers = #tpu.dot_dimension_numbers<[2], [1], [1], [2], [0, 0, 0, 1, 1, 2], [0], [0]>} : vector<4x8x8xbf16>, vector<4x8x8xbf16>, vector<4x8x8xf32> -> vector<4x8x8xf32>
    %82 = vector.shape_cast %81 : vector<4x8x8xf32> to vector<32x8xf32>
    %83 = vector.extract_strided_slice %13 {offsets = [0, 24], sizes = [32, 8], strides = [1, 1]} : vector<32x32xf32> to vector<32x8xf32>
    %84 = vector.shape_cast %83 : vector<32x8xf32> to vector<4x8x8xf32>
    %85 = arith.truncf %84 : vector<4x8x8xf32> to vector<4x8x8xbf16>
    %86 = vector.extract_strided_slice %9 {offsets = [0, 24], sizes = [32, 8], strides = [1, 1]} : vector<32x32xf32> to vector<32x8xf32>
    %87 = vector.shape_cast %86 : vector<32x8xf32> to vector<4x8x8xf32>
    %88 = arith.truncf %87 : vector<4x8x8xf32> to vector<4x8x8xbf16>
    %89 = vector.extract_strided_slice %10 {offsets = [0, 24], sizes = [32, 8], strides = [1, 1]} : vector<32x32xf32> to vector<32x8xf32>
    %90 = vector.shape_cast %89 : vector<32x8xf32> to vector<4x8x8xf32>
    %91 = arith.truncf %90 : vector<4x8x8xf32> to vector<4x8x8xbf16>
    %cst_18 = arith.constant dense<0.000000e+00> : vector<4x8x8xf32>
    %92 = tpu.matmul %85, %88, %cst_18 {dimension_numbers = #tpu.dot_dimension_numbers<[2], [2], [1], [1], [0, 0, 0, 1, 1, 1], [0], [0]>} : vector<4x8x8xbf16>, vector<4x8x8xbf16>, vector<4x8x8xf32> -> vector<4x8x8xf32>
    %cst_19 = arith.constant dense<0xFF800000> : vector<4x8xf32>
    %93 = vector.multi_reduction <maximumf>, %92, %cst_19 [2] : vector<4x8x8xf32> to vector<4x8xf32>
    %94 = vector.shape_cast %93 : vector<4x8xf32> to vector<4x8x1xf32>
    %95 = vector.broadcast %94 : vector<4x8x1xf32> to vector<4x8x8xf32>
    %96 = arith.subf %92, %95 : vector<4x8x8xf32>
    %97 = math.exp %96 : vector<4x8x8xf32>
    %cst_20 = arith.constant dense<0.000000e+00> : vector<4x8xf32>
    %98 = vector.multi_reduction <add>, %97, %cst_20 [2] : vector<4x8x8xf32> to vector<4x8xf32>
    %99 = vector.shape_cast %98 : vector<4x8xf32> to vector<4x8x1xf32>
    %100 = tpu.reciprocal %99 {approx = true} : vector<4x8x1xf32> -> vector<4x8x1xf32>
    %101 = vector.broadcast %100 : vector<4x8x1xf32> to vector<4x8x8xf32>
    %102 = arith.mulf %97, %101 : vector<4x8x8xf32>
    %103 = arith.truncf %102 : vector<4x8x8xf32> to vector<4x8x8xbf16>
    %cst_21 = arith.constant dense<0.000000e+00> : vector<4x8x8xf32>
    %104 = tpu.matmul %103, %91, %cst_21 {dimension_numbers = #tpu.dot_dimension_numbers<[2], [1], [1], [2], [0, 0, 0, 1, 1, 2], [0], [0]>} : vector<4x8x8xbf16>, vector<4x8x8xbf16>, vector<4x8x8xf32> -> vector<4x8x8xf32>
    %105 = vector.shape_cast %104 : vector<4x8x8xf32> to vector<32x8xf32>
    %106 = tpu.concatenate %36, %59, %82, %105 in 1 : vector<32x8xf32>, vector<32x8xf32>, vector<32x8xf32>, vector<32x8xf32> -> vector<32x32xf32>
    %107 = arith.truncf %106 : vector<32x32xf32> to vector<32x32xbf16>
    %c0_22 = arith.constant 0 : index
    %c0_23 = arith.constant 0 : index
    %108 = vector.load %arg4[%c0_22, %c0_23] : memref<32x32xbf16, #tpu.memory_space<vmem>>, vector<32x32xbf16>
    %cst_24 = arith.constant dense<0.000000e+00> : vector<32x32xf32>
    %109 = tpu.matmul %107, %108, %cst_24 {dimension_numbers = #tpu.dot_dimension_numbers<[1], [1], [0], [0], [0, 0, 1, 0], [], []>} : vector<32x32xbf16>, vector<32x32xbf16>, vector<32x32xf32> -> vector<32x32xf32>
    %c0_25 = arith.constant 0 : index
    %c0_26 = arith.constant 0 : index
    %110 = vector.load %arg5[%c0_25, %c0_26] : memref<1x32xf32, #tpu.memory_space<vmem>>, vector<1x32xf32>
    %111 = vector.broadcast %110 : vector<1x32xf32> to vector<32x32xf32>
    %112 = arith.addf %109, %111 : vector<32x32xf32>
    %113 = vector.shape_cast %112 : vector<32x32xf32> to vector<2x16x32xf32>
    %114 = arith.truncf %113 : vector<2x16x32xf32> to vector<2x16x32xbf16>
    %c0_27 = arith.constant 0 : index
    %c0_28 = arith.constant 0 : index
    %c0_29 = arith.constant 0 : index
    %115 = vector.load %arg6[%c0_27, %c0_28, %c0_29] : memref<2x16x32xbf16, #tpu.memory_space<vmem>>, vector<2x16x32xbf16>
    tpu.vector_store %arg6[%c0_27, %c0_28, %c0_29], %114 {strides = array<i32>} : memref<2x16x32xbf16, #tpu.memory_space<vmem>>, vector<2x16x32xbf16>,
    return
  }
  func.func @transform_0(%arg0: i32) -> (i32, i32) {
    %c0_i32 = arith.constant 0 : i32
    %c0_i32_0 = arith.constant 0 : i32
    %c0_i32_1 = arith.constant 0 : i32
    return %c0_i32, %c0_i32_0 : i32, i32
  }
  func.func @transform_1(%arg0: i32) -> (i32, i32) {
    %c0_i32 = arith.constant 0 : i32
    %c0_i32_0 = arith.constant 0 : i32
    %c0_i32_1 = arith.constant 0 : i32
    return %c0_i32, %c0_i32_0 : i32, i32
  }
  func.func @transform_2(%arg0: i32) -> (i32, i32) {
    %c0_i32 = arith.constant 0 : i32
    %c0_i32_0 = arith.constant 0 : i32
    %c0_i32_1 = arith.constant 0 : i32
    return %c0_i32, %c0_i32_0 : i32, i32
  }
  func.func @transform_3(%arg0: i32) -> (i32, i32) {
    %c0_i32 = arith.constant 0 : i32
    %c0_i32_0 = arith.constant 0 : i32
    %c0_i32_1 = arith.constant 0 : i32
    return %c0_i32, %c0_i32_0 : i32, i32
  }
  func.func @transform_4(%arg0: i32) -> (i32, i32) {
    %c0_i32 = arith.constant 0 : i32
    %c0_i32_0 = arith.constant 0 : i32
    %c0_i32_1 = arith.constant 0 : i32
    return %c0_i32, %c0_i32_0 : i32, i32
  }
  func.func @transform_5(%arg0: i32) -> (i32, i32, i32) {
    %c0_i32 = arith.constant 0 : i32
    %c0_i32_0 = arith.constant 0 : i32
    %c0_i32_1 = arith.constant 0 : i32
    %c0_i32_2 = arith.constant 0 : i32
    return %c0_i32, %c0_i32_0, %c0_i32_1 : i32, i32, i32
  }
}

</mosaic_0001>

<bundles_post_ra>
// kernel: tpu_custom_call.1
= control target key start
LH: loop header
LB: loop body
LE: loop exit
PB: predicated region body
PF: predicated region fallthrough
CT: control target
= control target key end

     0   :  { %vm70_vm0 = vcmask 261120   ;;  %s1756_s0 = inlined_call_operand.vmem [shape: f32[16,32], index: 0, kind: input, shape index: {}]   ;;  %s1757_s1 = inlined_call_operand.vmem [shape: f32[16,32], index: 1, kind: input, shape index: {}]   ;;  %s1758_s2 = inlined_call_operand.vmem [shape: bf16[96,32], index: 2, kind: input, shape index: {}]   ;;  %s1759_s3 = inlined_call_operand.vmem [shape: bf16[32,32], index: 3, kind: input, shape index: {}]   ;;  %s1760_s4 = inlined_call_operand.vmem [shape: f32[1,32], index: 4, kind: input, shape index: {}]   ;;  %s1761_s5 = inlined_call_operand.hbm [shape: bf16[2,16,32], index: 5, kind: output, shape index: {}]  }
   0x1   :  { %v1253_v0 = vld [vmem:[%s1758_s2 + $0x28] sm:$0xff] }
   0x2   :  { %v93_v1 = vsel %vm70_vm0, %v1253_v0, 0 }
   0x3   :  { %10 = vsyncpa [#allocation3], 0  ;;  %97 = vmatpush.bf16.xpose.msra.mxu0 %v93_v1  ;;  %v1252_v2 = vld [vmem:[%s1758_s2 + $0x20] sm:$0xff]  ;;  %v1251_v4 = vld [vmem:[%s1758_s2 + $0x18] sm:$0xff]  ;;  %s1394_s12 = smov 96   ;;  %vm131_vm1 = vcmask 64512  }
   0x4   :  { %v90_v3 = vsel %vm70_vm0, %v1252_v2, 0  ;;  %v87_v5 = vsel %vm70_vm0, %v1251_v4, 0  ;;  %v1250_v6 = vld [vmem:[%s1758_s2 + $0x10] sm:$0xff]  ;;  %v1249_v8 = vld [vmem:[%s1758_s2 + $0x8] sm:$0xff]  ;;  %v1248_v10 = vld [vmem:[%s1758_s2] sm:$0xff]  ;;  %vm276_vm2 = vcmask 1043456  }
   0x5   :  { %v84_v7 = vsel %vm70_vm0, %v1250_v6, 0  ;;  %v81_v9 = vsel %vm70_vm0, %v1249_v8, 0  ;;  %v78_v11 = vsel %vm70_vm0, %v1248_v10, 0  ;;  %v22_v12 = vld [vmem:[%s1756_s0] sm:$0xff]  ;;  %v23_v13 = vld [vmem:[%s1756_s0 + $0x8] sm:$0xff]  ;;  %s1393_s0 = smov 64  }
   0x6   :  { %v26_v14 = vpack.c.bf16 %v23_v13, %v22_v12  ;;  %v24_v15 = vld [vmem:[%s1757_s1] sm:$0xff]  ;;  %v25_v16 = vld [vmem:[%s1757_s1 + $0x8] sm:$0xff]  ;;  %s1395_s1 = smov 88   ;;  %s1396_s13 = smov 120   ;;  %vm1092_vm3 = vcmask 130048   ;;  %vm1097_vm4 = vcmask 195584  }
   0x7   :  { %v27_v17 = vpack.c.bf16 %v25_v16, %v24_v15  ;;  %s1397_s14 = smov 80   ;;  %s1398_s15 = smov 56   ;;  %vm1157_vm5 = vcmask 257024  }
   0x8   :  { %s1399_s16 = smov 112   ;;  %s1400_s17 = smov 48  }
   0x9   :  { %s1401_s18 = smov 72   ;;  %s1402_s19 = smov 104  }
   0xa   :  { %s1403_s20 = smov 40   ;;  %s1404_s21 = smov 8  }
   0xb   :  { %98 = vmatpush.bf16.xpose.msra.mxu0 %v90_v3  ;;  %s1405_s22 = smov 16   ;;  %s1406_s23 = smov 24  }
   0xc   :  { %s1407_s29 = smov [#allocation2]   ;;  %s1168_s7 = sshll.u32 %s1761_s5, 4  ;;  %s1169_s7 = int_to_ptr.hbm [resolvable:$true] %s1168_s7 }
   0xd   :  { %s1166_s30 = sshll.u32 %s1407_s29, 4  ;;  %s1408_s8 = smov 4   ;;  %s1167_s30 = int_to_ptr.vmem [resolvable:$true] %s1166_s30 }
  0x13   :  { %99 = vmatpush.bf16.xpose.msra.mxu0 %v87_v5 }
  0x1b   :  { %100 = vmatpush.bf16.xpose.msra.mxu0 %v84_v7 }
  0x23   :  { %101 = vmatpush.bf16.xpose.msra.mxu0 %v81_v9 }
  0x2b   :  { %102 = vmatpush.bf16.xpose.msra.mxu0 %v78_v11 }
  0x32   :  { %1204 = vmatmul.msk.bf16.vlgmr.msra.gmra.mxu0 %vm70_vm0, %v26_v14 }
  0x42   :  { %1205 = vmatmul.msk.bf16.gmra.mxu0 %vm70_vm0, %v27_v17 }
  0xaf   :  { %v104_v18 = vpop.f32.mrf.mxu0 }
  0xb0   :  { %v122_v19 = vpack.c.bf16 %v104_v18, %v104_v18  ;;  %v114_v45 = vmul.f32 0.35355338, %v104_v18 }
  0xb2   :  { %v127_v20 = vunpack.c.l.b16 %v122_v19  ;;  %v1505_v48 = vpack.c.bf16 %v114_v45, %v114_v45 }
  0xb4   :  { %v1477_v21 = vpack.c.b16 %v127_v20, %v127_v20 }
  0xb6   :  { %271 = vrot.lane.b32.xlu2 %v1477_v21, %s1393_s0  ;;  %129 = vrot.lane.b32.xlu0 %v1477_v21, %s1394_s12 }
  0xb7   :  { %v106_v22 = vpop.f32.mrf.mxu0 }
  0xb8   :  { %v123_v23 = vpack.c.bf16 %v106_v22, %v106_v22  ;;  %v115_v56 = vmul.f32 0.35355338, %v106_v22 }
  0xba   :  { %v152_v24 = vunpack.c.l.b16 %v123_v23  ;;  %v1514_v57 = vpack.c.bf16 %v115_v56, %v115_v56 }
  0xbc   :  { %v1482_v25 = vpack.c.b16 %v152_v24, %v152_v24 }
  0xbe   :  { %154 = vrot.lane.b32.xlu1 %v1482_v25, %s1394_s12 }
  0xbf   :  { %v109_v26 = vpop.f32.mrf.mxu0 }
  0xc0   :  { %v124_v27 = vpack.c.bf16 %v109_v26, %v109_v26  ;;  %v116_v36 = vmul.f32 0.35355338, %v109_v26 }
  0xc2   :  { %v176_v28 = vunpack.c.l.b16 %v124_v27  ;;  %v1498_v38 = vpack.c.bf16 %v116_v36, %v116_v36  ;;  %v409_v36 = vunpack.c.l.b16 %v1505_v48 }
  0xc4   :  { %v1485_v29 = vpack.c.b16 %v176_v28, %v176_v28 }
  0xc6   :  { %314 = vrot.lane.b32.xlu2 %v1485_v29, %s1393_s0  ;;  %178 = vrot.lane.b32.xlu0 %v1485_v29, %s1394_s12 }
  0xc7   :  { %v111_v30 = vpop.f32.mrf.mxu0 }
  0xc8   :  { %v125_v31 = vpack.c.bf16 %v111_v30, %v111_v30  ;;  %v117_v46 = vmul.f32 0.35355338, %v111_v30 }
  0xca   :  { %v200_v32 = vunpack.c.l.b16 %v125_v31  ;;  %v119_v49 = vpack.c.bf16 %v117_v46, %v117_v46 }
  0xcc   :  { %v1490_v33 = vpack.c.b16 %v200_v32, %v200_v32  ;;  %v383_v6 = vunpack.c.l.b16 %v119_v49 }
  0xce   :  { %293 = vrot.lane.b32.xlu0 %v1482_v25, %s1393_s0  ;;  %335 = vrot.lane.b32.xlu2 %v1490_v33, %s1393_s0  ;;  %v1522_v7 = vpack.c.b16 %v383_v6, %v383_v6 }
  0xcf   :  { %202 = vrot.lane.b32.xlu1 %v1490_v33, %s1394_s12 }
 0x110   :  { %v272_v37 = vpop.permute.xlu2 %271 }
 0x111   :  { %v278_v41 = vsel %vm276_vm2, %v272_v37, 0  ;;  %v357_v37 = vunpack.c.l.b16 %v1498_v38 }
 0x120   :  { %v315_v42 = vpop.permute.xlu2 %314 }
 0x121   :  { %v320_v55 = vsel %vm276_vm2, %v315_v42, 0 }
 0x128   :  { %v130_v34 = vpop.permute.xlu0 %129  ;;  %v336_v47 = vpop.permute.xlu2 %335 }
 0x129   :  { %v136_v35 = vsel %vm131_vm1, %v130_v34, 0  ;;  %v341_v51 = vsel %vm276_vm2, %v336_v47, 0 }
 0x12a   :  { %145 = vmatpush.bf16.xpose.msra.mxu2 %v136_v35 }
 0x130   :  { %v155_v39 = vpop.permute.xlu1 %154 }
 0x131   :  { %1206 = vmatmul.msk.bf16.vlgmr.msra.gmra.mxu2 %vm131_vm1, %v1498_v38  ;;  %v160_v40 = vsel %vm131_vm1, %v155_v39, 0  ;;  %v1540_v39 = vpack.c.b16 %v409_v36, %v409_v36 }
 0x132   :  { %169 = vmatpush.bf16.xpose.msrb.mxu2 %v160_v40  ;;  %v1546_v40 = vpack.c.b16 %v357_v37, %v357_v37 }
 0x138   :  { %v179_v43 = vpop.permute.xlu0 %178 }
 0x139   :  { %v184_v44 = vsel %vm131_vm1, %v179_v43, 0 }
 0x13a   :  { %287 = vmatpush.bf16.msra.mxu2 %v278_v41  ;;  %193 = vmatpush.bf16.xpose.msra.mxu3 %v184_v44  ;;  %v435_v41 = vunpack.c.l.b16 %v1514_v57 }
 0x13c   :  { %v1551_v42 = vpack.c.b16 %v435_v41, %v435_v41 }
 0x140   :  { %v294_v50 = vpop.permute.xlu0 %293 }
 0x141   :  { %v203_v52 = vpop.permute.xlu1 %202  ;;  %1207 = vmatmul.msk.bf16.vlgmr.msrb.gmra.mxu2 %vm131_vm1, %v119_v49  ;;  %1208 = vmatmul.msk.bf16.vlgmr.msra.gmra.mxu3 %vm131_vm1, %v1505_v48  ;;  %v299_v53 = vsel %vm276_vm2, %v294_v50, 0 }
 0x142   :  { %350 = vmatpush.bf16.msrb.mxu2 %v341_v51  ;;  %v208_v54 = vsel %vm131_vm1, %v203_v52, 0  ;;  %308 = vmatpush.bf16.msrb.mxu3 %v299_v53 }
 0x143   :  { %217 = vmatpush.bf16.xpose.msra.mxu1 %v208_v54 }
 0x14a   :  { %1209 = vmatmul.msk.bf16.vlgmr.msra.gmra.mxu1 %vm131_vm1, %v1514_v57 }
 0x14b   :  { %329 = vmatpush.bf16.msrb.mxu1 %v320_v55 }
 0x1b4   :  { %v147_v58 = vpop.f32.mrf.mxu2 }
 0x1b5   :  { %v223_v59 = vsel %vm131_vm1, %v147_v58, -inf }
 0x1b6   :  { %224 = vmax.xlane.f32.xlu2 %v223_v59 }
 0x1bc   :  { %v149_v60 = vpop.f32.mrf.mxu2 }
 0x1c4   :  { %v171_v61 = vpop.f32.mrf.mxu2  ;;  %v195_v62 = vpop.f32.mrf.mxu3 }
 0x1c5   :  { %v229_v63 = vsel %vm131_vm1, %v195_v62, -inf  ;;  %v226_v0 = vsel %vm131_vm1, %v171_v61, -inf }
 0x1c6   :  { %230 = vmax.xlane.f32.xlu2 %v229_v63  ;;  %227 = vmax.xlane.f32.xlu1 %v226_v0 }
 0x1c7   :  { %v219_v1 = vpop.f32.mrf.mxu1 }
 0x1c8   :  { %v232_v2 = vsel %vm131_vm1, %v219_v1, -inf }
 0x1c9   :  { %233 = vmax.xlane.f32.xlu0 %v232_v2 }
 0x1cc   :  { %v173_v3 = vpop.f32.mrf.mxu2  ;;  %v197_v4 = vpop.f32.mrf.mxu3 }
 0x1cf   :  { %v221_v5 = vpop.f32.mrf.mxu1 }
 0x1dd   :  { %361 = vrot.lane.b32.xlu0 %v1477_v21, %s1395_s1 }
 0x1de   :  { %385 = vrot.lane.b32.xlu2 %v1522_v7, %s1396_s13 }
 0x1df   :  { %387 = vrot.lane.b32.xlu1 %v1482_v25, %s1395_s1 }
 0x1e6   :  { %413 = vrot.lane.b32.xlu2 %v1485_v29, %s1395_s1 }
 0x229   :  { %v225_v8 = vpop.xlane.xlu2 %224 }
 0x22a   :  { %v235_v9 = vsub.f32 %v147_v58, %v225_v8 }
 0x22c   :  { %v239_v10 = vmul.f32 1.442695, %v235_v9 }
 0x22e   :  { %1303 = vpow2.f32 %v239_v10 }
 0x234   :  { %v1304_v11 = vpop.eup %1303 }
 0x235   :  { %v247_v12 = vsel %vm131_vm1, %v1304_v11, 0.0 }
 0x236   :  { %248 = vadd.xlane.f32.xlu2 %v247_v12 }
 0x239   :  { %v231_v13 = vpop.xlane.xlu2 %230  ;;  %v228_v14 = vpop.xlane.xlu1 %227 }
 0x23a   :  { %v237_v15 = vsub.f32 %v195_v62, %v231_v13  ;;  %v236_v16 = vsub.f32 %v171_v61, %v228_v14 }
 0x23c   :  { %v243_v17 = vmul.f32 1.442695, %v237_v15  ;;  %v241_v18 = vmul.f32 1.442695, %v236_v16  ;;  %v234_v19 = vpop.xlane.xlu0 %233 }
 0x23d   :  { %v238_v20 = vsub.f32 %v219_v1, %v234_v19 }
 0x23e   :  { %1305 = vpow2.f32 %v243_v17 }
 0x23f   :  { %1307 = vpow2.f32 %v241_v18  ;;  %v245_v22 = vmul.f32 1.442695, %v238_v20 }
 0x241   :  { %1309 = vpow2.f32 %v245_v22  ;;  %v386_v38 = vpop.permute.xlu2 %385 }
 0x244   :  { %v1306_v23 = vpop.eup %1305 }
 0x245   :  { %v1308_v24 = vpop.eup %1307  ;;  %v253_v26 = vsel %vm131_vm1, %v1306_v23, 0.0 }
 0x246   :  { %254 = vadd.xlane.f32.xlu2 %v253_v26  ;;  %v250_v27 = vsel %vm131_vm1, %v1308_v24, 0.0 }
 0x247   :  { %v1310_v28 = vpop.eup %1309  ;;  %251 = vadd.xlane.f32.xlu1 %v250_v27 }
 0x248   :  { %v256_v30 = vsel %vm131_vm1, %v1310_v28, 0.0 }
 0x249   :  { %257 = vadd.xlane.f32.xlu0 %v256_v30  ;;  %v414_v43 = vpop.permute.xlu2 %413 }
 0x24a   :  { %v419_v48 = vsel %vm131_vm1, %v414_v43, 0 }
 0x24f   :  { %v362_v31 = vpop.permute.xlu0 %361 }
 0x250   :  { %v367_v32 = vsel %vm131_vm1, %v362_v31, 0 }
 0x251   :  { %376 = vmatpush.bf16.xpose.msra.mxu3 %v367_v32  ;;  %v388_v34 = vpop.permute.xlu1 %387 }
 0x252   :  { %v393_v35 = vsel %vm131_vm1, %v388_v34, 0 }
 0x253   :  { %402 = vmatpush.bf16.xpose.msra.mxu1 %v393_v35 }
 0x25d   :  { %439 = vrot.lane.b32.xlu0 %v1490_v33, %s1395_s1 }
 0x25e   :  { %411 = vrot.lane.b32.xlu2 %v1540_v39, %s1396_s13 }
 0x260   :  { %359 = vrot.lane.b32.xlu1 %v1546_v40, %s1396_s13 }
 0x266   :  { %437 = vrot.lane.b32.xlu2 %v1551_v42, %s1396_s13 }
 0x2a9   :  { %v249_v44 = vpop.xlane.xlu2 %248 }
 0x2aa   :  { %1311 = vrcp.f32 %v249_v44 }
 0x2b0   :  { %v1312_v45 = vpop.eup %1311 }
 0x2b1   :  { %v263_v46 = vmul.f32 %v1312_v45, %v1304_v11 }
 0x2b3   :  { %v267_v47 = vpack.c.bf16 %v263_v46, %v263_v46 }
 0x2b5   :  { %1210 = vmatmul.msk.bf16.vlgmr.msra.gmra.mxu2 %vm131_vm1, %v267_v47 }
 0x2b6   :  { %428 = vmatpush.bf16.xpose.msra.mxu2 %v419_v48 }
 0x2b9   :  { %v255_v49 = vpop.xlane.xlu2 %254 }
 0x2ba   :  { %1313 = vrcp.f32 %v255_v49  ;;  %v252_v50 = vpop.xlane.xlu1 %251 }
 0x2bb   :  { %1315 = vrcp.f32 %v252_v50 }
 0x2bc   :  { %v258_v51 = vpop.xlane.xlu0 %257 }
 0x2bd   :  { %1317 = vrcp.f32 %v258_v51 }
 0x2c0   :  { %v1314_v52 = vpop.eup %1313 }
 0x2c1   :  { %v1316_v53 = vpop.eup %1315  ;;  %v265_v54 = vmul.f32 %v1314_v52, %v1306_v23  ;;  %v412_v0 = vpop.permute.xlu2 %411 }
 0x2c2   :  { %v264_v55 = vmul.f32 %v1316_v53, %v1308_v24 }
 0x2c3   :  { %v1318_v56 = vpop.eup %1317  ;;  %v269_v57 = vpack.c.bf16 %v265_v54, %v265_v54 }
 0x2c4   :  { %v266_v58 = vmul.f32 %v1318_v56, %v1310_v28  ;;  %v268_v59 = vpack.c.bf16 %v264_v55, %v264_v55 }
 0x2c5   :  { %1212 = vmatmul.msk.bf16.vlgmr.msrb.gmra.mxu1 %vm131_vm1, %v269_v57 }
 0x2c6   :  { %v270_v60 = vpack.c.bf16 %v266_v58, %v266_v58  ;;  %1211 = vmatmul.msk.bf16.vlgmr.msrb.gmra.mxu3 %vm131_vm1, %v268_v59 }
 0x2c8   :  { %1213 = vmatmul.msk.bf16.vlgmr.msrb.gmra.mxu2 %vm131_vm1, %v270_v60 }
 0x2c9   :  { %v438_v1 = vpop.permute.xlu2 %437 }
 0x2cf   :  { %v440_v61 = vpop.permute.xlu0 %439 }
 0x2d0   :  { %v445_v62 = vsel %vm131_vm1, %v440_v61, 0 }
 0x2d1   :  { %454 = vmatpush.bf16.xpose.msrb.mxu3 %v445_v62 }
 0x2d2   :  { %v360_v63 = vpop.permute.xlu1 %359 }
 0x2d5   :  { %1215 = vmatmul.msk.bf16.vlgmr.msra.gmra.mxu1 %vm131_vm1, %v386_v38 }
 0x2d6   :  { %1214 = vmatmul.msk.bf16.vlgmr.msra.gmra.mxu3 %vm131_vm1, %v360_v63 }
 0x2d8   :  { %1216 = vmatmul.msk.bf16.vlgmr.msra.gmra.mxu2 %vm131_vm1, %v412_v0 }
 0x2e6   :  { %1217 = vmatmul.msk.bf16.vlgmr.msrb.gmra.mxu3 %vm131_vm1, %v438_v1 }
 0x338   :  { %v1565_v2 = vpop.f32.mrf.mxu2 }
 0x340   :  { %v291_v3 = vpop.f32.mrf.mxu2 }
 0x342   :  { %v1567_v4 = vpop.f32.mrf.mxu1 }
 0x349   :  { %v1569_v5 = vpop.f32.mrf.mxu3 }
 0x34a   :  { %v333_v6 = vpop.f32.mrf.mxu1 }
 0x34b   :  { %v1571_v8 = vpop.f32.mrf.mxu2 }
 0x351   :  { %v312_v9 = vpop.f32.mrf.mxu3 }
 0x352   :  { %v404_v10 = vpop.f32.mrf.mxu1 }
 0x353   :  { %v354_v11 = vpop.f32.mrf.mxu2  ;;  %v463_v12 = vsel %vm131_vm1, %v404_v10, -inf }
 0x354   :  { %464 = vmax.xlane.f32.xlu1 %v463_v12 }
 0x359   :  { %v378_v13 = vpop.f32.mrf.mxu3 }
 0x35a   :  { %v406_v14 = vpop.f32.mrf.mxu1  ;;  %v460_v15 = vsel %vm131_vm1, %v378_v13, -inf }
 0x35b   :  { %461 = vmax.xlane.f32.xlu2 %v460_v15  ;;  %v430_v16 = vpop.f32.mrf.mxu2 }
 0x35c   :  { %v466_v17 = vsel %vm131_vm1, %v430_v16, -inf }
 0x35d   :  { %467 = vmax.xlane.f32.xlu0 %v466_v17 }
 0x361   :  { %v380_v18 = vpop.f32.mrf.mxu3 }
 0x363   :  { %v432_v19 = vpop.f32.mrf.mxu2 }
 0x369   :  { %v456_v20 = vpop.f32.mrf.mxu3 }
 0x36a   :  { %v469_v23 = vsel %vm131_vm1, %v456_v20, -inf }
 0x36d   :  { %617 = vrot.lane.b32.xlu1 %v1482_v25, %s1397_s14 }
 0x371   :  { %v458_v22 = vpop.f32.mrf.mxu3 }
 0x373   :  { %529 = vrot.lane.b32.xlu2 %v1482_v25, %s1398_s15 }
 0x37b   :  { %508 = vrot.lane.b32.xlu2 %v1477_v21, %s1398_s15 }
 0x383   :  { %615 = vrot.lane.b32.xlu2 %v1522_v7, %s1399_s16 }
 0x38b   :  { %594 = vrot.lane.b32.xlu2 %v1477_v21, %s1397_s14 }
 0x393   :  { %638 = vrot.lane.b32.xlu2 %v1540_v39, %s1399_s16 }
 0x397   :  { %470 = vmax.xlane.f32.xlu1 %v469_v23 }
 0x39b   :  { %663 = vrot.lane.b32.xlu2 %v1490_v33, %s1397_s14 }
 0x3c7   :  { %v465_v24 = vpop.xlane.xlu1 %464 }
 0x3c8   :  { %v473_v26 = vsub.f32 %v404_v10, %v465_v24 }
 0x3ca   :  { %v478_v27 = vmul.f32 1.442695, %v473_v26 }
 0x3cc   :  { %1319 = vpow2.f32 %v478_v27 }
 0x3ce   :  { %v462_v28 = vpop.xlane.xlu2 %461 }
 0x3cf   :  { %v472_v30 = vsub.f32 %v378_v13, %v462_v28 }
 0x3d0   :  { %v468_v31 = vpop.xlane.xlu0 %467 }
 0x3d1   :  { %v476_v32 = vmul.f32 1.442695, %v472_v30  ;;  %v474_v34 = vsub.f32 %v430_v16, %v468_v31 }
 0x3d2   :  { %v1320_v35 = vpop.eup %1319 }
 0x3d3   :  { %1321 = vpow2.f32 %v476_v32  ;;  %v480_v36 = vmul.f32 1.442695, %v474_v34  ;;  %v487_v37 = vsel %vm131_vm1, %v1320_v35, 0.0 }
 0x3d4   :  { %488 = vadd.xlane.f32.xlu0 %v487_v37 }
 0x3d5   :  { %1323 = vpow2.f32 %v480_v36 }
 0x3d6   :  { %v530_v41 = vpop.permute.xlu2 %529 }
 0x3d7   :  { %v535_v38 = vsel %vm276_vm2, %v530_v41, 0 }
 0x3d8   :  { %544 = vmatpush.bf16.msrb.mxu2 %v535_v38 }
 0x3d9   :  { %v1322_v43 = vpop.eup %1321 }
 0x3da   :  { %v484_v45 = vsel %vm131_vm1, %v1322_v43, 0.0 }
 0x3db   :  { %v1324_v44 = vpop.eup %1323 }
 0x3dc   :  { %485 = vadd.xlane.f32.xlu0 %v484_v45  ;;  %v490_v46 = vsel %vm131_vm1, %v1324_v44, 0.0 }
 0x3dd   :  { %491 = vadd.xlane.f32.xlu1 %v490_v46 }
 0x3de   :  { %v509_v47 = vpop.permute.xlu2 %508 }
 0x3df   :  { %v514_v48 = vsel %vm276_vm2, %v509_v47, 0  ;;  %v618_v49 = vpop.permute.xlu1 %617 }
 0x3e0   :  { %523 = vmatpush.bf16.msrb.mxu1 %v514_v48  ;;  %v623_v50 = vsel %vm131_vm1, %v618_v49, 0 }
 0x3e1   :  { %632 = vmatpush.bf16.xpose.msra.mxu2 %v623_v50 }
 0x3e6   :  { %v616_v51 = vpop.permute.xlu2 %615 }
 0x3ee   :  { %v595_v52 = vpop.permute.xlu2 %594 }
 0x3ef   :  { %v600_v53 = vsel %vm131_vm1, %v595_v52, 0 }
 0x3f0   :  { %609 = vmatpush.bf16.xpose.msra.mxu1 %v600_v53  ;;  %550 = vrot.lane.b32.xlu0 %v1485_v29, %s1398_s15 }
 0x3f6   :  { %640 = vrot.lane.b32.xlu1 %v1485_v29, %s1397_s14  ;;  %v639_v13 = vpop.permute.xlu2 %638 }
 0x3fe   :  { %571 = vrot.lane.b32.xlu1 %v1490_v33, %s1398_s15  ;;  %v664_v17 = vpop.permute.xlu2 %663 }
 0x406   :  { %592 = vrot.lane.b32.xlu1 %v1546_v40, %s1399_s16 }
 0x40a   :  { %v471_v54 = vpop.xlane.xlu1 %470 }
 0x40b   :  { %v475_v55 = vsub.f32 %v456_v20, %v471_v54  ;;  %v669_v20 = vsel %vm131_vm1, %v664_v17, 0 }
 0x40d   :  { %v482_v56 = vmul.f32 1.442695, %v475_v55 }
 0x40e   :  { %661 = vrot.lane.b32.xlu1 %v1551_v42, %s1399_s16 }
 0x40f   :  { %1325 = vpow2.f32 %v482_v56 }
 0x415   :  { %v1326_v57 = vpop.eup %1325 }
 0x416   :  { %v493_v58 = vsel %vm131_vm1, %v1326_v57, 0.0 }
 0x41a   :  { %494 = vadd.xlane.f32.xlu0 %v493_v58 }
 0x42e   :  { %753 = vrot.lane.b32.xlu0 %v1482_v25, %s1400_s17 }
 0x447   :  { %v489_v59 = vpop.xlane.xlu0 %488 }
 0x448   :  { %1327 = vrcp.f32 %v489_v59 }
 0x44e   :  { %v1328_v60 = vpop.eup %1327 }
 0x44f   :  { %v501_v61 = vmul.f32 %v1328_v60, %v1320_v35  ;;  %v486_v62 = vpop.xlane.xlu0 %485 }
 0x450   :  { %1329 = vrcp.f32 %v486_v62  ;;  %v492_v0 = vpop.xlane.xlu1 %491 }
 0x451   :  { %v505_v63 = vpack.c.bf16 %v501_v61, %v501_v61  ;;  %1331 = vrcp.f32 %v492_v0 }
 0x453   :  { %1219 = vmatmul.msk.bf16.vlgmr.msrb.gmra.mxu2 %vm131_vm1, %v505_v63 }
 0x456   :  { %v1330_v1 = vpop.eup %1329 }
 0x457   :  { %v500_v3 = vmul.f32 %v1330_v1, %v1322_v43  ;;  %v1332_v9 = vpop.eup %1331 }
 0x458   :  { %v502_v10 = vmul.f32 %v1332_v9, %v1324_v44 }
 0x459   :  { %v504_v6 = vpack.c.bf16 %v500_v3, %v500_v3 }
 0x45a   :  { %v506_v14 = vpack.c.bf16 %v502_v10, %v502_v10 }
 0x45b   :  { %1218 = vmatmul.msk.bf16.vlgmr.msrb.gmra.mxu1 %vm131_vm1, %v504_v6 }
 0x462   :  { %v551_v11 = vpop.permute.xlu0 %550 }
 0x463   :  { %v556_v12 = vsel %vm276_vm2, %v551_v11, 0  ;;  %1223 = vmatmul.msk.bf16.vlgmr.msra.gmra.mxu2 %vm131_vm1, %v616_v51 }
 0x464   :  { %565 = vmatpush.bf16.msra.mxu3 %v556_v12 }
 0x467   :  { %1220 = vmatmul.msk.bf16.vlgmr.msra.gmra.mxu3 %vm131_vm1, %v506_v14 }
 0x468   :  { %v641_v15 = vpop.permute.xlu1 %640 }
 0x469   :  { %v646_v16 = vsel %vm131_vm1, %v641_v15, 0 }
 0x46a   :  { %655 = vmatpush.bf16.xpose.msrb.mxu3 %v646_v16 }
 0x470   :  { %v572_v18 = vpop.permute.xlu1 %571 }
 0x471   :  { %v577_v19 = vsel %vm276_vm2, %v572_v18, 0 }
 0x472   :  { %586 = vmatpush.bf16.msrb.mxu0 %v577_v19 }
 0x476   :  { %678 = vmatpush.bf16.xpose.msra.mxu0 %v669_v20 }
 0x477   :  { %1224 = vmatmul.msk.bf16.vlgmr.msrb.gmra.mxu3 %vm131_vm1, %v639_v13 }
 0x478   :  { %v593_v22 = vpop.permute.xlu1 %592 }
 0x479   :  { %1222 = vmatmul.msk.bf16.vlgmr.msra.gmra.mxu1 %vm131_vm1, %v593_v22 }
 0x480   :  { %v662_v31 = vpop.permute.xlu1 %661 }
 0x48d   :  { %v495_v23 = vpop.xlane.xlu0 %494 }
 0x48e   :  { %1333 = vrcp.f32 %v495_v23 }
 0x494   :  { %v1334_v24 = vpop.eup %1333 }
 0x495   :  { %v503_v26 = vmul.f32 %v1334_v24, %v1326_v57 }
 0x497   :  { %v507_v27 = vpack.c.bf16 %v503_v26, %v503_v26 }
 0x499   :  { %1221 = vmatmul.msk.bf16.vlgmr.msrb.gmra.mxu0 %vm131_vm1, %v507_v27 }
 0x4a0   :  { %v754_v28 = vpop.permute.xlu0 %753 }
 0x4a1   :  { %v759_v30 = vsel %vm276_vm2, %v754_v28, 0 }
 0x4a2   :  { %768 = vmatpush.bf16.msrb.mxu2 %v759_v30 }
 0x4a9   :  { %1225 = vmatmul.msk.bf16.vlgmr.msra.gmra.mxu0 %vm131_vm1, %v662_v31 }
 0x4d6   :  { %v1624_v32 = vpop.f32.mrf.mxu2 }
 0x4d8   :  { %v1626_v34 = vpop.f32.mrf.mxu1 }
 0x4d9   :  { %v1272_v35 = vpack.i.bf16 %v1624_v32, %v1626_v34 }
 0x4de   :  { %v548_v36 = vpop.f32.mrf.mxu2 }
 0x4e0   :  { %v527_v37 = vpop.f32.mrf.mxu1 }
 0x4e6   :  { %v634_v41 = vpop.f32.mrf.mxu2 }
 0x4e7   :  { %v687_v38 = vsel %vm131_vm1, %v634_v41, -inf }
 0x4e8   :  { %688 = vmax.xlane.f32.xlu2 %v687_v38 }
 0x4ea   :  { %v1631_v43 = vpop.f32.mrf.mxu3 }
 0x4ee   :  { %v636_v44 = vpop.f32.mrf.mxu2 }
 0x4f2   :  { %v569_v45 = vpop.f32.mrf.mxu3 }
 0x4f6   :  { %v611_v46 = vpop.f32.mrf.mxu1 }
 0x4f7   :  { %v684_v47 = vsel %vm131_vm1, %v611_v46, -inf }
 0x4f8   :  { %685 = vmax.xlane.f32.xlu1 %v684_v47 }
 0x4fa   :  { %v657_v48 = vpop.f32.mrf.mxu3 }
 0x4fb   :  { %v690_v49 = vsel %vm131_vm1, %v657_v48, -inf }
 0x4fc   :  { %691 = vmax.xlane.f32.xlu0 %v690_v49 }
 0x4fe   :  { %v613_v50 = vpop.f32.mrf.mxu1 }
 0x500   :  { %732 = vrot.lane.b32.xlu2 %v1477_v21, %s1400_s17 }
 0x502   :  { %v659_v51 = vpop.f32.mrf.mxu3 }
 0x511   :  { %841 = vrot.lane.b32.xlu1 %v1482_v25, %s1401_s18 }
 0x516   :  { %v1639_v52 = vpop.f32.mrf.mxu0 }
 0x517   :  { %v1287_v53 = vpack.i.bf16 %v1639_v52, %v1631_v43 }
 0x51e   :  { %v590_v54 = vpop.f32.mrf.mxu0 }
 0x526   :  { %v680_v55 = vpop.f32.mrf.mxu0 }
 0x527   :  { %v693_v56 = vsel %vm131_vm1, %v680_v55, -inf }
 0x528   :  { %694 = vmax.xlane.f32.xlu0 %v693_v56 }
 0x52e   :  { %v682_v57 = vpop.f32.mrf.mxu0 }
 0x55b   :  { %v689_v58 = vpop.xlane.xlu2 %688 }
 0x55c   :  { %v697_v59 = vsub.f32 %v634_v41, %v689_v58 }
 0x55e   :  { %v702_v60 = vmul.f32 1.442695, %v697_v59 }
 0x560   :  { %1335 = vpow2.f32 %v702_v60 }
 0x563   :  { %v733_v61 = vpop.permute.xlu2 %732 }
 0x564   :  { %v738_v62 = vsel %vm276_vm2, %v733_v61, 0 }
 0x565   :  { %747 = vmatpush.bf16.msrb.mxu1 %v738_v62 }
 0x566   :  { %v1336_v63 = vpop.eup %1335 }
 0x567   :  { %v711_v0 = vsel %vm131_vm1, %v1336_v63, 0.0 }
 0x568   :  { %712 = vadd.xlane.f32.xlu0 %v711_v0 }
 0x56b   :  { %v686_v1 = vpop.xlane.xlu1 %685 }
 0x56c   :  { %v696_v3 = vsub.f32 %v611_v46, %v686_v1 }
 0x56e   :  { %v700_v6 = vmul.f32 1.442695, %v696_v3 }
 0x56f   :  { %v692_v9 = vpop.xlane.xlu0 %691 }
 0x570   :  { %1337 = vpow2.f32 %v700_v6  ;;  %v698_v10 = vsub.f32 %v657_v48, %v692_v9 }
 0x572   :  { %v704_v11 = vmul.f32 1.442695, %v698_v10 }
 0x574   :  { %1339 = vpow2.f32 %v704_v11 }
 0x576   :  { %v1338_v12 = vpop.eup %1337 }
 0x577   :  { %v708_v13 = vsel %vm131_vm1, %v1338_v12, 0.0 }
 0x578   :  { %709 = vadd.xlane.f32.xlu2 %v708_v13 }
 0x57a   :  { %v1340_v14 = vpop.eup %1339 }
 0x57b   :  { %v714_v15 = vsel %vm131_vm1, %v1340_v14, 0.0 }
 0x57c   :  { %715 = vadd.xlane.f32.xlu1 %v714_v15  ;;  %774 = vrot.lane.b32.xlu0 %v1485_v29, %s1400_s17 }
 0x583   :  { %v842_v16 = vpop.permute.xlu1 %841 }
 0x584   :  { %v847_v17 = vsel %vm131_vm1, %v842_v16, 0 }
 0x585   :  { %856 = vmatpush.bf16.xpose.msra.mxu2 %v847_v17 }
 0x590   :  { %839 = vrot.lane.b32.xlu2 %v1522_v7, %s1402_s19 }
 0x595   :  { %818 = vrot.lane.b32.xlu1 %v1477_v21, %s1401_s18 }
 0x598   :  { %795 = vrot.lane.b32.xlu2 %v1490_v33, %s1400_s17 }
 0x59b   :  { %v695_v18 = vpop.xlane.xlu0 %694 }
 0x59c   :  { %v699_v19 = vsub.f32 %v680_v55, %v695_v18 }
 0x59d   :  { %864 = vrot.lane.b32.xlu1 %v1485_v29, %s1401_s18 }
 0x59e   :  { %v706_v20 = vmul.f32 1.442695, %v699_v19 }
 0x5a0   :  { %1341 = vpow2.f32 %v706_v20  ;;  %816 = vrot.lane.b32.xlu2 %v1546_v40, %s1402_s19 }
 0x5a5   :  { %862 = vrot.lane.b32.xlu1 %v1540_v39, %s1402_s19 }
 0x5a6   :  { %v1342_v22 = vpop.eup %1341 }
 0x5a7   :  { %v717_v7 = vsel %vm131_vm1, %v1342_v22, 0.0 }
 0x5a8   :  { %887 = vrot.lane.b32.xlu2 %v1490_v33, %s1401_s18  ;;  %718 = vadd.xlane.f32.xlu0 %v717_v7 }
 0x5ad   :  { %885 = vrot.lane.b32.xlu1 %v1551_v42, %s1402_s19 }
 0x5db   :  { %v713_v23 = vpop.xlane.xlu0 %712 }
 0x5dc   :  { %1343 = vrcp.f32 %v713_v23 }
 0x5e2   :  { %v1344_v24 = vpop.eup %1343 }
 0x5e3   :  { %v725_v26 = vmul.f32 %v1344_v24, %v1336_v63 }
 0x5e5   :  { %v729_v27 = vpack.c.bf16 %v725_v26, %v725_v26 }
 0x5e7   :  { %1227 = vmatmul.msk.bf16.vlgmr.msrb.gmra.mxu2 %vm131_vm1, %v729_v27 }
 0x5eb   :  { %v710_v28 = vpop.xlane.xlu2 %709 }
 0x5ec   :  { %1345 = vrcp.f32 %v710_v28 }
 0x5ee   :  { %v775_v40 = vpop.permute.xlu0 %774 }
 0x5ef   :  { %v780_v39 = vsel %vm276_vm2, %v775_v40, 0  ;;  %v716_v30 = vpop.xlane.xlu1 %715 }
 0x5f0   :  { %1347 = vrcp.f32 %v716_v30  ;;  %789 = vmatpush.bf16.msra.mxu3 %v780_v39 }
 0x5f2   :  { %v1346_v31 = vpop.eup %1345 }
 0x5f3   :  { %v724_v36 = vmul.f32 %v1346_v31, %v1338_v12  ;;  %v840_v37 = vpop.permute.xlu2 %839 }
 0x5f5   :  { %v728_v41 = vpack.c.bf16 %v724_v36, %v724_v36 }
 0x5f6   :  { %v1348_v42 = vpop.eup %1347 }
 0x5f7   :  { %v726_v38 = vmul.f32 %v1348_v42, %v1340_v14  ;;  %1226 = vmatmul.msk.bf16.vlgmr.msrb.gmra.mxu1 %vm131_vm1, %v728_v41  ;;  %1231 = vmatmul.msk.bf16.vlgmr.msra.gmra.mxu2 %vm131_vm1, %v840_v37 }
 0x5f9   :  { %v730_v44 = vpack.c.bf16 %v726_v38, %v726_v38 }
 0x5fb   :  { %v796_v45 = vpop.permute.xlu2 %795  ;;  %1228 = vmatmul.msk.bf16.vlgmr.msra.gmra.mxu3 %vm131_vm1, %v730_v44 }
 0x5fc   :  { %v801_v46 = vsel %vm276_vm2, %v796_v45, 0 }
 0x5fd   :  { %810 = vmatpush.bf16.msrb.mxu0 %v801_v46 }
 0x603   :  { %v817_v47 = vpop.permute.xlu2 %816 }
 0x607   :  { %v819_v48 = vpop.permute.xlu1 %818 }
 0x608   :  { %v824_v49 = vsel %vm131_vm1, %v819_v48, 0 }
 0x609   :  { %833 = vmatpush.bf16.xpose.msra.mxu1 %v824_v49 }
 0x60b   :  { %v888_v50 = vpop.permute.xlu2 %887 }
 0x60c   :  { %v893_v51 = vsel %vm131_vm1, %v888_v50, 0 }
 0x60d   :  { %902 = vmatpush.bf16.xpose.msra.mxu0 %v893_v51 }
 0x60f   :  { %v865_v54 = vpop.permute.xlu1 %864 }
 0x610   :  { %v870_v55 = vsel %vm131_vm1, %v865_v54, 0  ;;  %1230 = vmatmul.msk.bf16.vlgmr.msra.gmra.mxu1 %vm131_vm1, %v817_v47 }
 0x611   :  { %879 = vmatpush.bf16.xpose.msrb.mxu3 %v870_v55 }
 0x617   :  { %v863_v56 = vpop.permute.xlu1 %862 }
 0x618   :  { %1232 = vmatmul.msk.bf16.vlgmr.msrb.gmra.mxu3 %vm131_vm1, %v863_v56 }
 0x61b   :  { %v719_v57 = vpop.xlane.xlu0 %718 }
 0x61c   :  { %1349 = vrcp.f32 %v719_v57 }
 0x61f   :  { %v886_v61 = vpop.permute.xlu1 %885 }
 0x622   :  { %v1350_v58 = vpop.eup %1349 }
 0x623   :  { %v727_v59 = vmul.f32 %v1350_v58, %v1342_v22 }
 0x625   :  { %v731_v60 = vpack.c.bf16 %v727_v59, %v727_v59 }
 0x627   :  { %1229 = vmatmul.msk.bf16.vlgmr.msrb.gmra.mxu0 %vm131_vm1, %v731_v60 }
 0x637   :  { %1233 = vmatmul.msk.bf16.vlgmr.msra.gmra.mxu0 %vm131_vm1, %v886_v61 }
 0x66a   :  { %v770_v62 = vpop.f32.mrf.mxu2 }
 0x672   :  { %v772_v63 = vpop.f32.mrf.mxu2 }
 0x674   :  { %v749_v0 = vpop.f32.mrf.mxu1 }
 0x67a   :  { %v858_v1 = vpop.f32.mrf.mxu2 }
 0x67b   :  { %v911_v3 = vsel %vm131_vm1, %v858_v1, -inf }
 0x67c   :  { %v751_v6 = vpop.f32.mrf.mxu1  ;;  %912 = vmax.xlane.f32.xlu2 %v911_v3 }
 0x67e   :  { %v1678_v9 = vpop.f32.mrf.mxu3 }
 0x682   :  { %v860_v10 = vpop.f32.mrf.mxu2 }
 0x686   :  { %v793_v11 = vpop.f32.mrf.mxu3 }
 0x68d   :  { %v835_v12 = vpop.f32.mrf.mxu1 }
 0x68e   :  { %v908_v13 = vsel %vm131_vm1, %v835_v12, -inf }
 0x68f   :  { %909 = vmax.xlane.f32.xlu0 %v908_v13 }
 0x694   :  { %956 = vrot.lane.b32.xlu2 %v1477_v21, %s1403_s20  ;;  %v1277_v21 = vpack.i.bf16 %v770_v62, %v749_v0 }
 0x695   :  { %v837_v14 = vpop.f32.mrf.mxu1 }
 0x69b   :  { %v881_v15 = vpop.f32.mrf.mxu3 }
 0x69c   :  { %1019 = vrot.lane.b32.xlu2 %v1490_v33, %s1403_s20  ;;  %v914_v16 = vsel %vm131_vm1, %v881_v15, -inf }
 0x69d   :  { %915 = vmax.xlane.f32.xlu1 %v914_v16 }
 0x6a3   :  { %v883_v17 = vpop.f32.mrf.mxu3 }
 0x6a4   :  { %v1686_v18 = vpop.f32.mrf.mxu0  ;;  %1273 = vrot.lane.b32.xlu2 %v1272_v35, %s1404_s21  ;;  %v1255_v17 = vld [vmem:[%s1759_s3 + $0x8] sm:$0xff] }
 0x6a5   :  { %v1292_v19 = vpack.i.bf16 %v1686_v18, %v1678_v9 }
 0x6ac   :  { %v814_v20 = vpop.f32.mrf.mxu0  ;;  %1278 = vrot.lane.b32.xlu2 %v1277_v21, %s1405_s22  ;;  %v1132_v21 = vsel %vm70_vm0, %v1255_v17, 0 }
 0x6ad   :  { %v1254_v20 = vld [vmem:[%s1759_s3] sm:$0xff] }
 0x6b4   :  { %v904_v33 = vpop.f32.mrf.mxu0  ;;  %1288 = vrot.lane.b32.xlu2 %v1287_v53, %s1404_s21 }
 0x6b5   :  { %v917_v22 = vsel %vm131_vm1, %v904_v33, -inf }
 0x6b6   :  { %918 = vmax.xlane.f32.xlu0 %v917_v22 }
 0x6bc   :  { %v906_v7 = vpop.f32.mrf.mxu0 }
 0x6ef   :  { %v913_v23 = vpop.xlane.xlu2 %912 }
 0x6f0   :  { %v921_v28 = vsub.f32 %v858_v1, %v913_v23 }
 0x6f2   :  { %v926_v43 = vmul.f32 1.442695, %v921_v28 }
 0x6f7   :  { %v957_v32 = vpop.permute.xlu2 %956 }
 0x6f8   :  { %v962_v34 = vsel %vm276_vm2, %v957_v32, 0 }
 0x6f9   :  { %971 = vmatpush.bf16.msrb.mxu1 %v962_v34 }
 0x6fd   :  { %1140 = vmatpush.bf16.xpose.msra.mxu1 %v1132_v21 }
 0x6ff   :  { %v1020_v35 = vpop.permute.xlu2 %1019 }
 0x700   :  { %v1025_v24 = vsel %vm276_vm2, %v1020_v35, 0 }
 0x701   :  { %1034 = vmatpush.bf16.msrb.mxu0 %v1025_v24 }
 0x702   :  { %v910_v26 = vpop.xlane.xlu0 %909 }
 0x703   :  { %v920_v27 = vsub.f32 %v835_v12, %v910_v26 }
 0x705   :  { %v924_v40 = vmul.f32 1.442695, %v920_v27 }
 0x707   :  { %1351 = vpow2.f32 %v924_v40  ;;  %v1274_v18 = vpop.permute.xlu2 %1273 }
 0x708   :  { %1353 = vpow2.f32 %v926_v43  ;;  %v1276_v23 = vunpack.i.h.bf16 %v1274_v18  ;;  %v1275_v32 = vunpack.i.l.bf16 %v1274_v18 }
 0x70a   :  { %v1089_v26 = vsel %vm131_vm1, %v1569_v5, %v1276_v23  ;;  %v1088_v27 = vsel %vm131_vm1, %v1565_v2, %v1275_v32 }
 0x70d   :  { %v1352_v52 = vpop.eup %1351 }
 0x70e   :  { %v932_v53 = vsel %vm131_vm1, %v1352_v52, 0.0  ;;  %v1354_v31 = vpop.eup %1353 }
 0x70f   :  { %933 = vadd.xlane.f32.xlu0 %v932_v53  ;;  %v935_v37 = vsel %vm131_vm1, %v1354_v31, 0.0 }
 0x710   :  { %v916_v39 = vpop.xlane.xlu1 %915 }
 0x711   :  { %v922_v30 = vsub.f32 %v881_v15, %v916_v39 }
 0x713   :  { %v928_v36 = vmul.f32 1.442695, %v922_v30 }
 0x715   :  { %1355 = vpow2.f32 %v928_v36 }
 0x717   :  { %936 = vadd.xlane.f32.xlu0 %v935_v37 }
 0x71b   :  { %v1356_v41 = vpop.eup %1355 }
 0x71c   :  { %v938_v42 = vsel %vm131_vm1, %v1356_v41, 0.0 }
 0x71d   :  { %939 = vadd.xlane.f32.xlu1 %v938_v42 }
 0x729   :  { %v919_v38 = vpop.xlane.xlu0 %918 }
 0x72a   :  { %v923_v44 = vsub.f32 %v904_v33, %v919_v38  ;;  %v1129_v33 = vsel %vm70_vm0, %v1254_v20, 0 }
 0x72b   :  { %977 = vrot.lane.b32.xlu0 %v1482_v25, %s1403_s20  ;;  %1141 = vmatpush.bf16.xpose.msra.mxu1 %v1129_v33 }
 0x72c   :  { %v930_v45 = vmul.f32 1.442695, %v923_v44 }
 0x72e   :  { %1357 = vpow2.f32 %v930_v45 }
 0x734   :  { %v1358_v46 = vpop.eup %1357 }
 0x735   :  { %v941_v47 = vsel %vm131_vm1, %v1358_v46, 0.0 }
 0x736   :  { %998 = vrot.lane.b32.xlu1 %v1485_v29, %s1403_s20 }
 0x755   :  { %942 = vadd.xlane.f32.xlu0 %v941_v47 }
 0x782   :  { %v934_v48 = vpop.xlane.xlu0 %933 }
 0x783   :  { %1359 = vrcp.f32 %v934_v48 }
 0x789   :  { %v1360_v49 = vpop.eup %1359 }
 0x78a   :  { %v948_v50 = vmul.f32 %v1360_v49, %v1352_v52  ;;  %v937_v54 = vpop.xlane.xlu0 %936 }
 0x78b   :  { %1361 = vrcp.f32 %v937_v54 }
 0x78c   :  { %v952_v51 = vpack.c.bf16 %v948_v50, %v948_v50 }
 0x78e   :  { %1234 = vmatmul.msk.bf16.vlgmr.msrb.gmra.mxu1 %vm131_vm1, %v952_v51 }
 0x790   :  { %v940_v55 = vpop.xlane.xlu1 %939 }
 0x791   :  { %v1362_v25 = vpop.eup %1361  ;;  %1363 = vrcp.f32 %v940_v55 }
 0x792   :  { %v949_v29 = vmul.f32 %v1362_v25, %v1354_v31 }
 0x794   :  { %v953_v58 = vpack.c.bf16 %v949_v29, %v949_v29 }
 0x797   :  { %v1364_v59 = vpop.eup %1363 }
 0x798   :  { %v950_v60 = vmul.f32 %v1364_v59, %v1356_v41 }
 0x79a   :  { %v954_v63 = vpack.c.bf16 %v950_v60, %v950_v60 }
 0x79d   :  { %v978_v56 = vpop.permute.xlu0 %977 }
 0x79e   :  { %v983_v57 = vsel %vm276_vm2, %v978_v56, 0 }
 0x79f   :  { %992 = vmatpush.bf16.msrb.mxu2 %v983_v57 }
 0x7a2   :  { %1235 = vmatmul.msk.bf16.vlgmr.msrb.gmra.mxu2 %vm131_vm1, %v953_v58 }
 0x7a8   :  { %v999_v61 = vpop.permute.xlu1 %998 }
 0x7a9   :  { %v1004_v62 = vsel %vm276_vm2, %v999_v61, 0 }
 0x7aa   :  { %1013 = vmatpush.bf16.msra.mxu3 %v1004_v62 }
 0x7ad   :  { %1236 = vmatmul.msk.bf16.vlgmr.msra.gmra.mxu3 %vm131_vm1, %v954_v63 }
 0x7c8   :  { %v943_v0 = vpop.xlane.xlu0 %942 }
 0x7c9   :  { %1365 = vrcp.f32 %v943_v0 }
 0x7cf   :  { %v1366_v1 = vpop.eup %1365 }
 0x7d0   :  { %v951_v3 = vmul.f32 %v1366_v1, %v1358_v46 }
 0x7d2   :  { %v955_v6 = vpack.c.bf16 %v951_v3, %v951_v3 }
 0x7d4   :  { %1237 = vmatmul.msk.bf16.vlgmr.msrb.gmra.mxu0 %vm131_vm1, %v955_v6 }
 0x80b   :  { %v973_v10 = vpop.f32.mrf.mxu1 }
 0x813   :  { %v975_v11 = vpop.f32.mrf.mxu1 }
 0x825   :  { %v994_v12 = vpop.f32.mrf.mxu2 }
 0x826   :  { %v1282_v13 = vpack.i.bf16 %v994_v12, %v973_v10 }
 0x828   :  { %1283 = vrot.lane.b32.xlu1 %v1282_v13, %s1406_s23 }
 0x82d   :  { %v996_v14 = vpop.f32.mrf.mxu2 }
 0x830   :  { %v1015_v15 = vpop.f32.mrf.mxu3  ;;  %1293 = vrot.lane.b32.xlu1 %v1292_v19, %s1405_s22  ;;  %v1279_v19 = vpop.permute.xlu2 %1278 }
 0x831   :  { %v1281_v34 = vunpack.i.h.bf16 %v1279_v19  ;;  %v1280_v35 = vunpack.i.l.bf16 %v1279_v19 }
 0x833   :  { %v1093_v43 = vsel %vm1092_vm3, %v1088_v27, %v1280_v35  ;;  %v1094_v52 = vsel %vm1092_vm3, %v1089_v26, %v1281_v34 }
 0x838   :  { %v1017_v16 = vpop.f32.mrf.mxu3  ;;  %v1289_v31 = vpop.permute.xlu2 %1288 }
 0x839   :  { %v1291_v37 = vunpack.i.h.bf16 %v1289_v31  ;;  %v1290_v5 = vunpack.i.l.bf16 %v1289_v31 }
 0x83b   :  { %v1091_v38 = vsel %vm131_vm1, %v1571_v8, %v1291_v37  ;;  %v1090_v44 = vsel %vm131_vm1, %v1567_v4, %v1290_v5  ;;  %v1302_v8 = vld [vmem:[%s1760_s4] ss:$0 sm:$0xff] }
 0x851   :  { %v1036_v22 = vpop.f32.mrf.mxu0 }
 0x852   :  { %v1297_v7 = vpack.i.bf16 %v1036_v22, %v1015_v15 }
 0x854   :  { %1298 = vrot.lane.b32.xlu0 %v1297_v7, %s1406_s23 }
 0x859   :  { %v1038_v9 = vpop.f32.mrf.mxu0 }
 0x89a   :  { %v1284_v24 = vpop.permute.xlu1 %1283 }
 0x89b   :  { %v1286_v28 = vunpack.i.h.bf16 %v1284_v24  ;;  %v1285_v40 = vunpack.i.l.bf16 %v1284_v24 }
 0x89d   :  { %v1099_v53 = vsel %vm1097_vm4, %v1094_v52, %v1286_v28  ;;  %v1098_v39 = vsel %vm1097_vm4, %v1093_v43, %v1285_v40 }
 0x89e   :  { %v1102_v30 = vpack.c.bf16 %v1099_v53, %v1098_v39 }
 0x8a0   :  { %1246 = vmatmul.msk.bf16.vlgmr.msra.gmra.mxu1 %vm70_vm0, %v1102_v30 }
 0x8a2   :  { %v1294_v36 = vpop.permute.xlu1 %1293 }
 0x8a3   :  { %v1296_v41 = vunpack.i.h.bf16 %v1294_v36  ;;  %v1295_v42 = vunpack.i.l.bf16 %v1294_v36 }
 0x8a5   :  { %v1096_v47 = vsel %vm1092_vm3, %v1091_v38, %v1296_v41  ;;  %v1095_v48 = vsel %vm1092_vm3, %v1090_v44, %v1295_v42 }
 0x8c6   :  { %v1299_v2 = vpop.permute.xlu0 %1298 }
 0x8c7   :  { %v1301_v45 = vunpack.i.h.bf16 %v1299_v2  ;;  %v1300_v46 = vunpack.i.l.bf16 %v1299_v2 }
 0x8c9   :  { %v1100_v49 = vsel %vm1097_vm4, %v1095_v48, %v1300_v46  ;;  %v1101_v50 = vsel %vm1097_vm4, %v1096_v47, %v1301_v45 }
 0x8ca   :  { %v1103_v51 = vpack.c.bf16 %v1101_v50, %v1100_v49 }
 0x8cc   :  { %1247 = vmatmul.msk.bf16.gmra.mxu1 %vm70_vm0, %v1103_v51 }
 0x91d   :  { %v1143_v54 = vpop.f32.mrf.mxu1 }
 0x91e   :  { %v1144_v25 = vadd.f32 %v1302_v8, %v1143_v54 }
 0x920   :  { %v1153_v4 = vpack.c.bf16 %v1144_v25, %v1144_v25 }
 0x922   :  { %1158 = vst.msk [vmem:[#allocation2] sm:$0xf] %vm1157_vm5, %v1153_v4 }
 0x925   :  { %v1145_v55 = vpop.f32.mrf.mxu1 }
 0x926   :  { %v1146_v29 = vadd.f32 %v1302_v8, %v1145_v55 }
 0x928   :  { %v1154_v56 = vpack.c.bf16 %v1146_v29, %v1146_v29 }
 0x92a   :  { %1159 = vst.msk [vmem:[#allocation2 + $0x4] sm:$0xf] %vm1157_vm5, %v1154_v56 }
 0x949   :  { %v1148_v57 = vpop.f32.mrf.mxu1 }
 0x94a   :  { %v1149_v58 = vadd.f32 %v1302_v8, %v1148_v57 }
 0x94c   :  { %v1155_v59 = vpack.c.bf16 %v1149_v58, %v1149_v58 }
 0x94e   :  { %1160 = vst.msk [vmem:[#allocation2 + $0x8] sm:$0xf] %vm1157_vm5, %v1155_v59 }
 0x951   :  { %v1150_v60 = vpop.f32.mrf.mxu1 }
 0x952   :  { %v1151_v61 = vadd.f32 %v1302_v8, %v1150_v60 }
 0x954   :  { %v1156_v62 = vpack.c.bf16 %v1151_v61, %v1151_v61 }
 0x956   :  { %1161 = vst.msk [vmem:[#allocation2 + $0xc] sm:$0xf] %vm1157_vm5, %v1156_v62 }
 0x957   :  { %1174 = dma.vmem_to_hbm [thread:$0]  %s1167_s30, 256, %s1169_s7, [#allocation3], %s1393_s0, %s1393_s0, %s1408_s8  }
 0x958   :  { %1391 = dma.done.wait [#allocation3], 256  }
 0x959   :  { %1392 = vsyncadd [#allocation3], 4294967040 }
 0x95a   :  { %1179 = vsyncpa [#allocation3], 1 }

</bundles_post_ra>
